<compile_context>
chip_gen: v7x
topology: tpu7x:2x2x1
jax: 0.10.0
libtpu: 0.0.40
codegen_flags: <defaults>
</compile_context>

<pallas_src>
import jax
import jax.numpy as jnp
from jax.experimental import pallas as pl
from jax.experimental.pallas import tpu as pltpu


def _round_up(n: int, m: int) -> int:
    return ((n + m - 1) // m) * m


def forecast_kernel(x_ref, w_ref, b_ref, o_ref):
    # x_ref: (TBR, 8F)  w_ref: (8F, 8D)  b_ref: (1, 8D)  o_ref: (TBR, 8D)
    y = jnp.dot(x_ref[...], w_ref[...], preferred_element_type=jnp.float32)
    y = y + b_ref[...]                        # broadcast bias over the row tile
    # relu(relu(y)) == relu(y): single ReLU, then +0.05 epilogue, all in f32.
    o_ref[...] = (jnp.maximum(y, 0.0) + 0.05).astype(o_ref.dtype)


def forecast(x, weight, bias, *, pack: int = 8, tbr_cap: int = 2048):
    """x: (B, n_features); weight: (n_demands, n_features) (PyTorch layout);
    bias: (n_demands,). Returns (B, n_demands)."""
    B, F = x.shape
    D = weight.shape[0]

    # Pad the batch only to a multiple of `pack` (<= pack-1 rows, and only
    # when needed).  No padding to the tile size: Pallas masks edge blocks.
    B8 = _round_up(B, pack)
    if B8 != B:
        x = jnp.pad(x, ((0, B8 - B), (0, 0)))
    rows = B8 // pack
    Kp = pack * F          # packed contraction dim (lane-dense, 256 for F=32)
    Np = pack * D          # packed output dim      (lane-dense, 128 for D=16)

    # Contiguous reshape (free) + block-diagonal weight + tiled bias.
    x_packed = x.reshape(rows, Kp)
    w_bd = jnp.kron(jnp.eye(pack, dtype=weight.dtype), weight.T)   # (Kp, Np)
    b_tiled = jnp.tile(bias, pack).reshape(1, Np)                  # (1, Np)

    # Tile the packed-row axis: multiple of 8 sublanes, capped, and >= 2 grid
    # steps when the batch is big enough so v7x can shard across both TCs.
    if rows <= 8:
        tbr = rows                      # full-dim block (escape clause)
        n_steps = 1
    else:
        n_steps = max(pl.cdiv(rows, tbr_cap), 2)
        tbr = _round_up(pl.cdiv(rows, n_steps), 8)
        n_steps = pl.cdiv(rows, tbr)    # last block may be ragged (masked)

    itemsize = jnp.dtype(x.dtype).itemsize
    cost = pl.CostEstimate(
        flops=2 * rows * Kp * Np,
        transcendentals=0,
        bytes_accessed=(rows * Kp + Kp * Np + Np + rows * Np) * itemsize,
    )

    out = pl.pallas_call(
        forecast_kernel,
        out_shape=jax.ShapeDtypeStruct((rows, Np), x.dtype),
        grid=(n_steps,),
        in_specs=[
            pl.BlockSpec((tbr, Kp), lambda i: (i, 0)),   # packed x tile, pipelined
            pl.BlockSpec((Kp, Np), lambda i: (0, 0)),    # block-diag weight, resident
            pl.BlockSpec((1, Np), lambda i: (0, 0)),     # tiled bias, resident
        ],
        out_specs=pl.BlockSpec((tbr, Np), lambda i: (i, 0)),
        compiler_params=pltpu.CompilerParams(
            dimension_semantics=("parallel",),            # batch axis -> both TCs on v7x
        ),
        cost_estimate=cost,
    )(x_packed, w_bd, b_tiled)

    out = out.reshape(B8, D)   # contiguous reshape back to (B8, D), free
    if B8 != B:
        out = out[:B]
    return out


def forecast_ref(x, weight, bias):
    f = jnp.maximum(x @ weight.T + bias, 0.0)
    return jnp.maximum(f, 0.0) + 0.05


if __name__ == "__main__":
    n_features, n_demands = 32, 16

    key = jax.random.PRNGKey(0)
    kx, kw, kb, kx2 = jax.random.split(key, 4)

    # Deterministic init mimicking nn.Linear's uniform(-1/sqrt(fan_in), ...)
    bound = 1.0 / jnp.sqrt(jnp.float32(n_features))
    weight = jax.random.uniform(kw, (n_demands, n_features), dtype=jnp.float32,
                                minval=-bound, maxval=bound)
    bias = jax.random.uniform(kb, (n_demands,), dtype=jnp.float32,
                              minval=-bound, maxval=bound)

    # Small primary test (batch=8, matches the module's typical use).
    B = 8
    x = jax.random.normal(kx, (B, n_features), dtype=jnp.float32)
    out = jax.block_until_ready(forecast(x, weight, bias))
    ref = forecast_ref(x, weight, bias)
    assert out.shape == (B, n_demands)
    assert jnp.allclose(out, ref, atol=1e-5, rtol=1e-5), "mismatch vs reference (B=8)"

    # Moderate test exercising the multi-step grid, ragged edge block and the
    # small (B % 8 != 0) pad path.
    B2 = 4101
    x2 = jax.random.normal(kx2, (B2, n_features), dtype=jnp.float32)
    out2 = jax.block_until_ready(forecast(x2, weight, bias, tbr_cap=256))
    ref2 = forecast_ref(x2, weight, bias)
    assert out2.shape == (B2, n_demands)
    assert jnp.allclose(out2, ref2, atol=1e-5, rtol=1e-5), "mismatch vs reference (B=4101)"

    print("KERNEL_OK")
</pallas_src>

<mosaic_0001>
module attributes {stable_mosaic.version = 11 : i64} {
  func.func @forecast_kernel(%arg0: i32, %arg1: memref<1x256xf32, #tpu.memory_space<vmem>>, %arg2: memref<256x128xf32, #tpu.memory_space<vmem>>, %arg3: memref<1x128xf32, #tpu.memory_space<vmem>>, %arg4: memref<1x128xf32, #tpu.memory_space<vmem>>) attributes {dimension_semantics = [#tpu.dimension_semantics<parallel>], iteration_bounds = array<i64: 1>, scalar_prefetch = 0 : i64, scratch_operands = 0 : i64, tpu.core_type = #tpu.core_type<tc>, window_params = [{transform_indices = @transform_0, window_bounds = array<i64: 1, 256>}, {pipeline_mode = #tpu.pipeline_mode<synchronous>, transform_indices = @transform_1, window_bounds = array<i64: 256, 128>}, {pipeline_mode = #tpu.pipeline_mode<synchronous>, transform_indices = @transform_2, window_bounds = array<i64: 1, 128>}, {transform_indices = @transform_3, window_bounds = array<i64: 1, 128>}]} {
    %c0 = arith.constant 0 : index
    %c0_0 = arith.constant 0 : index
    %0 = vector.load %arg1[%c0, %c0_0] : memref<1x256xf32, #tpu.memory_space<vmem>>, vector<1x256xf32>
    %c0_1 = arith.constant 0 : index
    %c0_2 = arith.constant 0 : index
    %1 = vector.load %arg2[%c0_1, %c0_2] : memref<256x128xf32, #tpu.memory_space<vmem>>, vector<256x128xf32>
    %cst = arith.constant dense<0.000000e+00> : vector<1x128xf32>
    %2 = tpu.matmul %0, %1, %cst {dimension_numbers = #tpu.dot_dimension_numbers<[1], [0], [0], [1], [0, 0, 1, 1], [], []>} : vector<1x256xf32>, vector<256x128xf32>, vector<1x128xf32> -> vector<1x128xf32>
    %c0_3 = arith.constant 0 : index
    %c0_4 = arith.constant 0 : index
    %3 = vector.load %arg3[%c0_3, %c0_4] : memref<1x128xf32, #tpu.memory_space<vmem>>, vector<1x128xf32>
    %4 = arith.addf %2, %3 : vector<1x128xf32>
    %cst_5 = arith.constant 0.000000e+00 : f32
    %5 = vector.broadcast %cst_5 : f32 to vector<1x128xf32>
    %6 = arith.maximumf %4, %5 : vector<1x128xf32>
    %cst_6 = arith.constant 5.000000e-02 : f32
    %7 = vector.broadcast %cst_6 : f32 to vector<1x128xf32>
    %8 = arith.addf %6, %7 : vector<1x128xf32>
    %c0_7 = arith.constant 0 : index
    %c0_8 = arith.constant 0 : index
    %9 = vector.load %arg4[%c0_7, %c0_8] : memref<1x128xf32, #tpu.memory_space<vmem>>, vector<1x128xf32>
    tpu.vector_store %arg4[%c0_7, %c0_8], %8 {strides = array<i32>} : memref<1x128xf32, #tpu.memory_space<vmem>>, vector<1x128xf32>,
    return
  }
  func.func @transform_0(%arg0: i32) -> (i32, i32) {
    %c0_i32 = arith.constant 0 : i32
    %c0_i32_0 = arith.constant 0 : i32
    return %arg0, %c0_i32 : i32, i32
  }
  func.func @transform_1(%arg0: i32) -> (i32, i32) {
    %c0_i32 = arith.constant 0 : i32
    %c0_i32_0 = arith.constant 0 : i32
    %c0_i32_1 = arith.constant 0 : i32
    return %c0_i32, %c0_i32_0 : i32, i32
  }
  func.func @transform_2(%arg0: i32) -> (i32, i32) {
    %c0_i32 = arith.constant 0 : i32
    %c0_i32_0 = arith.constant 0 : i32
    %c0_i32_1 = arith.constant 0 : i32
    return %c0_i32, %c0_i32_0 : i32, i32
  }
  func.func @transform_3(%arg0: i32) -> (i32, i32) {
    %c0_i32 = arith.constant 0 : i32
    %c0_i32_0 = arith.constant 0 : i32
    return %arg0, %c0_i32 : i32, i32
  }
}

</mosaic_0001>

<bundles_post_ra>
// kernel: tpu_custom_call.1
= control target key start
LH: loop header
LB: loop body
LE: loop exit
PB: predicated region body
PF: predicated region fallthrough
CT: control target
= control target key end

     0   :  { %8 = vsyncpa [#allocation3], 0  ;;  %s390_s0 = inlined_call_operand.hbm [shape: f32[1,256], index: 0, kind: input, shape index: {}]   ;;  %s391_s1 = inlined_call_operand.hbm [shape: f32[256,128], index: 1, kind: input, shape index: {}]   ;;  %s392_s2 = inlined_call_operand.vmem [shape: f32[1,128], index: 2, kind: input, shape index: {}]   ;;  %s393_s3 = inlined_call_operand.hbm [shape: f32[1,128], index: 3, kind: output, shape index: {}]  }
   0x1   :  { %9 = vsyncpa [#allocation6], 0 }
   0x2   :  { %10 = vsyncpa [#allocation4], 0  ;;  %s319_s12 = smov [#allocation2]   ;;  %s320_s14 = smov [#allocation5]  }
   0x3   :  { %s17_s13 = sshll.u32 %s319_s12, 4  ;;  %s26_s15 = sshll.u32 %s320_s14, 4  ;;  %s18_s13 = int_to_ptr.vmem [resolvable:$true] %s17_s13  ;;  %s344_s15 = int_to_ptr.vmem [resolvable:$true] %s26_s15 }
   0x4   :  { %s247_s18 = scalar_lea.hbm %s390_s0, 32 }
   0x5   :  { %p248_p0 = scmp.ne.s32.totalorder %s390_s0, %s247_s18  ;;  %p251_p1 = scmp.lt.u32.totalorder %s247_s18, %s390_s0 }
   0x7   :  { %p253_p2 = pnand %p251_p1, %p248_p0 }
   0x9   :  { %256 = shalt.err (!%p253_p2)
}
   0xa   :  { %s257_s23 = scalar_lea.vmem %s18_s13, 32  ;;  %p262_p4 = scmp.lt.s32.totalorder %s18_s13, %s18_s13 }
   0xb   :  { %p258_p3 = scmp.ne.s32.totalorder %s18_s13, %s257_s23  ;;  %p263_p5 = scmp.lt.s32.totalorder %s257_s23, %s257_s23 }
   0xd   :  { %p264_p6 = por %p263_p5, %p262_p4 }
   0xf   :  { %p265_p7 = pnand %p264_p6, %p258_p3 }
  0x11   :  { %268 = shalt.err (!%p265_p7)
}
  0x12   :  { %20 = dma.hbm_to_vmem [thread:$0]  %s390_s0, 32, %s18_s13, [#allocation3]  }
  0x13   :  { %s269_s28 = scalar_lea.hbm %s391_s1, 4096 }
  0x14   :  { %p270_p8 = scmp.ne.s32.totalorder %s391_s1, %s269_s28  ;;  %p273_p9 = scmp.lt.u32.totalorder %s269_s28, %s391_s1 }
  0x16   :  { %p275_p10 = pnand %p273_p9, %p270_p8 }
  0x18   :  { %278 = shalt.err (!%p275_p10)
}
  0x19   :  { %s279_s6 = scalar_lea.vmem %s344_s15, 4096  ;;  %p284_p12 = scmp.lt.s32.totalorder %s344_s15, %s344_s15 }
  0x1a   :  { %p280_p11 = scmp.ne.s32.totalorder %s344_s15, %s279_s6  ;;  %p285_p13 = scmp.lt.s32.totalorder %s279_s6, %s279_s6 }
  0x1c   :  { %p286_p0 = por %p285_p13, %p284_p12 }
  0x1e   :  { %p287_p1 = pnand %p286_p0, %p280_p11 }
  0x20   :  { %290 = shalt.err (!%p287_p1)
}
  0x21   :  { %s321_s0 = smov 128   ;;  %s322_s7 = smov 8  }
  0x22   :  { %32 = dma.hbm_to_vmem [thread:$0]  %s391_s1, 4096, %s344_s15, [#allocation6], %s321_s0, %s321_s0, %s322_s7  }
  0x23   :  { %313 = dma.done.wait [#allocation3], 32  }
  0x24   :  { %314 = vsyncadd [#allocation3], 4294967264 }
  0x25   :  { %315 = dma.done.wait [#allocation6], 4096  }
  0x26   :  { %316 = vsyncadd [#allocation6], 4294963200  ;;  %v76_v0 = vlaneseq  ;;  %v58_v1 = vld [vmem:[#allocation5 + $0x80] sm:$0xff]  ;;  %v59_v2 = vld [vmem:[#allocation5 + $0x88] sm:$0xff]  ;;  %s323_s11 = smov [#allocation7]  }
  0x27   :  { %v42_v3 = vld [vmem:[#allocation5] sm:$0xff]  ;;  %v210_v4 = vpack.c.bf16 %v59_v2, %v58_v1  ;;  %v43_v5 = vld [vmem:[#allocation5 + $0x8] sm:$0xff]  ;;  %v60_v6 = vld [vmem:[#allocation5 + $0x90] sm:$0xff]  ;;  %s165_s12 = sshll.u32 %s323_s11, 4  ;;  %s166_s12 = int_to_ptr.vmem [resolvable:$true] %s165_s12 }
  0x28   :  { %v61_v7 = vld [vmem:[#allocation5 + $0x98] sm:$0xff]  ;;  %v212_v8 = vpack.c.bf16 %v43_v5, %v42_v3  ;;  %v44_v10 = vld [vmem:[#allocation5 + $0x10] sm:$0xff]  ;;  %v62_v12 = vld [vmem:[#allocation5 + $0xa0] sm:$0xff]  ;;  %v77_v14 = vshrl.u32 %v76_v0, 7  ;;  %s291_s13 = scalar_lea.vmem %s166_s12, 16  ;;  %s295_s14 = scalar_lea.vmem %s166_s12, 32 }
  0x29   :  { %v214_v9 = vpack.c.bf16 %v61_v7, %v60_v6  ;;  %v45_v11 = vld [vmem:[#allocation5 + $0x18] sm:$0xff]  ;;  %211 = vmatprep.subr.bf16.mxu0 %v210_v4  ;;  %v63_v13 = vld [vmem:[#allocation5 + $0xa8] sm:$0xff]  ;;  %v46_v17 = vld [vmem:[#allocation5 + $0x20] sm:$0xff]  ;;  %p292_p2 = scmp.ne.s32.totalorder %s166_s12, %s291_s13  ;;  %p296_p3 = scmp.lt.s32.totalorder %s166_s12, %s166_s12 }
  0x2a   :  { %213 = vmatpush3.bf16.msra.mxu0 %v212_v8  ;;  %v216_v15 = vpack.c.bf16 %v45_v11, %v44_v10  ;;  %v218_v16 = vpack.c.bf16 %v63_v13, %v62_v12  ;;  %v47_v18 = vld [vmem:[#allocation5 + $0x28] sm:$0xff]  ;;  %v64_v19 = vld [vmem:[#allocation5 + $0xb0] sm:$0xff]  ;;  %v65_v20 = vld [vmem:[#allocation5 + $0xb8] sm:$0xff]  ;;  %v82_v21 = vsub.s32 1, %v77_v14  ;;  %v78_v52 = vsub.s32 0, %v77_v14  ;;  %p297_p4 = scmp.lt.s32.totalorder %s295_s14, %s291_s13 }
  0x2b   :  { %215 = vmatprep.subr.bf16.mxu0 %v214_v9  ;;  %v220_v22 = vpack.c.bf16 %v47_v18, %v46_v17  ;;  %v222_v23 = vpack.c.bf16 %v65_v20, %v64_v19  ;;  %v48_v24 = vld [vmem:[#allocation5 + $0x30] sm:$0xff]  ;;  %v49_v25 = vld [vmem:[#allocation5 + $0x38] sm:$0xff]  ;;  %v66_v26 = vld [vmem:[#allocation5 + $0xc0] sm:$0xff] }
  0x2c   :  { %v67_v27 = vld [vmem:[#allocation5 + $0xc8] sm:$0xff]  ;;  %v41_v28 = vld [vmem:[#allocation2] sm:$0x3]  ;;  %v224_v30 = vpack.c.bf16 %v49_v25, %v48_v24  ;;  %v50_v32 = vld [vmem:[#allocation5 + $0x40] sm:$0xff]  ;;  %p298_p5 = por %p297_p4, %p296_p3 }
  0x2d   :  { %v83_v29 = vrot.slane %v41_v28, %v82_v21  ;;  %v226_v31 = vpack.c.bf16 %v67_v27, %v66_v26  ;;  %v51_v33 = vld [vmem:[#allocation5 + $0x48] sm:$0xff]  ;;  %v68_v34 = vld [vmem:[#allocation5 + $0xd0] sm:$0xff]  ;;  %v69_v35 = vld [vmem:[#allocation5 + $0xd8] sm:$0xff]  ;;  %v79_v54 = vrot.slane %v41_v28, %v78_v52 }
  0x2e   :  { %217 = vmatpush3.bf16.msra.mxu0 %v216_v15  ;;  %v228_v36 = vpack.c.bf16 %v51_v33, %v50_v32  ;;  %v230_v37 = vpack.c.bf16 %v69_v35, %v68_v34  ;;  %v52_v38 = vld [vmem:[#allocation5 + $0x50] sm:$0xff]  ;;  %v53_v39 = vld [vmem:[#allocation5 + $0x58] sm:$0xff]  ;;  %v70_v40 = vld [vmem:[#allocation5 + $0xe0] sm:$0xff]  ;;  %p299_p6 = pnand %p298_p5, %p292_p2 }
  0x2f   :  { %219 = vmatprep.subr.bf16.mxu0 %v218_v16  ;;  %150 = vmatprep.mubr.f32.mxu0 %v83_v29  ;;  %v71_v41 = vld [vmem:[#allocation5 + $0xe8] sm:$0xff]  ;;  %v232_v42 = vpack.c.bf16 %v53_v39, %v52_v38  ;;  %v54_v44 = vld [vmem:[#allocation5 + $0x60] sm:$0xff]  ;;  %v72_v46 = vld [vmem:[#allocation5 + $0xf0] sm:$0xff] }
  0x30   :  { %v234_v43 = vpack.c.bf16 %v71_v41, %v70_v40  ;;  %v55_v45 = vld [vmem:[#allocation5 + $0x68] sm:$0xff]  ;;  %v73_v47 = vld [vmem:[#allocation5 + $0xf8] sm:$0xff]  ;;  %v56_v50 = vld [vmem:[#allocation5 + $0x70] sm:$0xff] }
  0x31   :  { %v236_v48 = vpack.c.bf16 %v55_v45, %v54_v44  ;;  %v238_v49 = vpack.c.bf16 %v73_v47, %v72_v46  ;;  %v57_v51 = vld [vmem:[#allocation5 + $0x78] sm:$0xff] }
  0x32   :  { %221 = vmatpush3.bf16.msra.mxu0 %v220_v22  ;;  %v240_v53 = vpack.c.bf16 %v57_v51, %v56_v50  ;;  %v74_v56 = vld [vmem:[%s392_s2] sm:$0x1] }
  0x33   :  { %223 = vmatprep.subr.bf16.mxu0 %v222_v23 }
  0x36   :  { %225 = vmatpush3.bf16.msra.mxu0 %v224_v30 }
  0x37   :  { %227 = vmatprep.subr.bf16.mxu0 %v226_v31 }
  0x3a   :  { %229 = vmatpush3.bf16.msra.mxu0 %v228_v36 }
  0x3b   :  { %231 = vmatprep.subr.bf16.mxu0 %v230_v37 }
  0x3e   :  { %233 = vmatpush3.bf16.msra.mxu0 %v232_v42 }
  0x3f   :  { %235 = vmatprep.subr.bf16.mxu0 %v234_v43 }
  0x42   :  { %237 = vmatpush3.bf16.msra.mxu0 %v236_v48 }
  0x43   :  { %239 = vmatprep.subr.bf16.mxu0 %v238_v49 }
  0x46   :  { %241 = vmatpush3.bf16.msra.mxu0 %v240_v53 }
  0x49   :  { %151 = vmatmul.mubr.f32.vlgmr.msra.gmra.mrb[0].mxu0 %v79_v54 }
 0x11c   :  { %v207_v55 = vpop.f32.mrb[0].mxu0 }
 0x11d   :  { %v208_v57 = vpop.f32.mrb[1].mxu0 }
 0x11e   :  { %v209_v58 = vadd.f32 %v208_v57, %v207_v55 }
 0x120   :  { %v153_v59 = vadd.f32 %v209_v58, %v74_v56 }
 0x122   :  { %v156_v60 = vmax.f32 %v153_v59, 0.0 }
 0x124   :  { %v157_v61 = vadd.f32 0.05, %v156_v60 }
 0x126   :  { %158 = vst [vmem:[#allocation7] sm:$0x1] %v157_v61 }
 0x127   :  { %302 = shalt.err (!%p299_p6)
}
 0x128   :  { %s303_s2 = scalar_lea.hbm %s393_s3, 16 }
 0x129   :  { %p304_p7 = scmp.ne.s32.totalorder %s393_s3, %s303_s2  ;;  %p307_p8 = scmp.lt.u32.totalorder %s303_s2, %s393_s3 }
 0x12b   :  { %p309_p9 = pnand %p307_p8, %p304_p7 }
 0x12d   :  { %312 = shalt.err (!%p309_p9)
}
 0x12e   :  { %168 = dma.vmem_to_hbm [thread:$0]  %s166_s12, 16, %s393_s3, [#allocation4]  }
 0x12f   :  { %317 = dma.done.wait [#allocation4], 16  }
 0x130   :  { %318 = vsyncadd [#allocation4], 4294967280 }
 0x131   :  { %172 = vsyncpa [#allocation3], 1 }
 0x132   :  { %173 = vsyncpa [#allocation6], 1 }
 0x133   :  { %174 = vsyncpa [#allocation4], 1 }

</bundles_post_ra>
